<compile_context>
chip_gen: v6e
topology: v6e:2x2x1
jax: 0.10.0
libtpu: 0.0.40
codegen_flags: <defaults>
</compile_context>

<pallas_src>
import functools

import jax
import jax.numpy as jnp
from jax import lax
from jax.experimental import pallas as pl
from jax.experimental.pallas import tpu as pltpu


def _sdpa_kernel(q_ref, k_ref, v_ref, o_ref, attn_ref, *, inv_temperature):
    # Block shapes: q (TB, TQ, D), k (TB, Lk, D), v (TB, Lk, Dv)
    q = q_ref[...]
    k = k_ref[...]
    v = v_ref[...]

    # scores = (q @ k^T) * (1/temperature), contracted on the shared D axis so no
    # transposed copy of K is materialized; f32 accumulation on the MXU.
    scores = lax.dot_general(
        q, k,
        dimension_numbers=(((2,), (2,)), ((0,), (0,))),
        preferred_element_type=jnp.float32,
    ) * inv_temperature                                    # (TB, TQ, Lk)

    # Exact softmax over the last axis (torch dim=2): full Lk is resident per step.
    # Exact reciprocal keeps parity with jax.nn.softmax at 1e-5 tolerance
    # (approx=True would introduce ~1e-3 relative error in the returned attn).
    m = jnp.max(scores, axis=-1, keepdims=True)
    p = jnp.exp(scores - m)
    denom = jnp.sum(p, axis=-1, keepdims=True)
    attn = p * pl.reciprocal(denom, approx=False)

    # output = attn @ v (batched contraction over Lk), f32 accumulate.
    out = lax.dot_general(
        attn.astype(v.dtype), v,
        dimension_numbers=(((2,), (1,)), ((0,), (0,))),
        preferred_element_type=jnp.float32,
    )                                                      # (TB, TQ, Dv)

    o_ref[...] = out.astype(o_ref.dtype)
    attn_ref[...] = attn.astype(attn_ref.dtype)


def _largest_divisor_leq(n, cap):
    cap = max(1, min(n, cap))
    for t in range(cap, 0, -1):
        if n % t == 0:
            return t
    return 1


def _choose_q_tile(lq, cap=256):
    # Whole Lq if it already fits the cap; otherwise the largest divisor that is a
    # multiple of 8 (sublane granule) so the (8,128) BlockSpec constraint holds.
    if lq <= cap:
        return lq
    for t in range(cap, 7, -1):
        if lq % t == 0 and t % 8 == 0:
            return t
    return lq  # fallback for awkward Lq: keep the whole sequence resident


def scaled_dot_product_attention(q, k, v, temperature):
    """q: (B, Lq, D), k: (B, Lk, D), v: (B, Lk, Dv) -> (output, attn)."""
    B, Lq, D = q.shape
    _, Lk, Dk = k.shape
    _, _, Dv = v.shape
    assert D == Dk and k.shape[0] == B and v.shape[0] == B and v.shape[1] == Lk

    itemsize = jnp.dtype(q.dtype).itemsize

    # ---- tile selection -----------------------------------------------------
    # Query tiling caps the f32 (TQ, Lk) score/attn slab; K/V stay fully resident
    # per step so the softmax remains exact single-pass.
    TQ = _choose_q_tile(Lq, cap=256)

    # Batch-block: amortize the ~0.35us/step grid overhead for small Lq/D by
    # processing several batch elements per step, under an ~8 MiB per-block
    # budget (double-buffered this stays well within v7x's 64 MiB VMEM).
    per_batch_bytes = (
        TQ * D * itemsize        # q tile
        + Lk * D * itemsize      # k (full)
        + Lk * Dv * itemsize     # v (full)
        + TQ * Dv * itemsize     # output tile
        + TQ * Lk * 4            # attn tile (f32)
    )
    budget = 8 * 1024 * 1024
    TB = _largest_divisor_leq(B, max(1, budget // max(1, per_batch_bytes)))

    block_bytes = TB * per_batch_bytes
    # ~2x for double buffering plus headroom; keep within physical VMEM budgets.
    vmem_limit = max(32 * 1024 * 1024,
                     min(int(2.5 * block_bytes) + (4 << 20), 120 * 1024 * 1024))

    kernel = functools.partial(_sdpa_kernel, inv_temperature=1.0 / float(temperature))

    out_shapes = (
        jax.ShapeDtypeStruct((B, Lq, Dv), q.dtype),
        jax.ShapeDtypeStruct((B, Lq, Lk), jnp.float32),
    )

    grid = (B // TB, Lq // TQ)

    return pl.pallas_call(
        kernel,
        out_shape=out_shapes,
        grid_spec=pltpu.PrefetchScalarGridSpec(
            num_scalar_prefetch=0,
            grid=grid,
            in_specs=[
                pl.BlockSpec((TB, TQ, D), lambda b, qi: (b, qi, 0)),
                pl.BlockSpec((TB, Lk, D), lambda b, qi: (b, 0, 0)),
                pl.BlockSpec((TB, Lk, Dv), lambda b, qi: (b, 0, 0)),
            ],
            out_specs=[
                pl.BlockSpec((TB, TQ, Dv), lambda b, qi: (b, qi, 0)),
                pl.BlockSpec((TB, TQ, Lk), lambda b, qi: (b, qi, 0)),
            ],
        ),
        compiler_params=pltpu.CompilerParams(
            dimension_semantics=("parallel", "parallel"),
            vmem_limit_bytes=vmem_limit,
        ),
    )(q, k, v)


def _reference(q, k, v, temperature):
    attn = jnp.einsum("bqd,bkd->bqk", q, k) / temperature
    attn = jax.nn.softmax(attn, axis=2)
    out = jnp.einsum("bqk,bkd->bqd", attn, v)
    return out, attn


if __name__ == "__main__":
    key = jax.random.PRNGKey(0)
    kq, kk, kv = jax.random.split(key, 3)

    B, Lq, Lk, D, Dv = 2, 8, 8, 32, 32
    temperature = float(D) ** 0.5  # typical: sqrt(d_k)

    q = jax.random.normal(kq, (B, Lq, D), dtype=jnp.float32)
    k = jax.random.normal(kk, (B, Lk, D), dtype=jnp.float32)
    v = jax.random.normal(kv, (B, Lk, Dv), dtype=jnp.float32)

    out, attn = scaled_dot_product_attention(q, k, v, temperature)
    out = jax.block_until_ready(out)
    attn = jax.block_until_ready(attn)

    ref_out, ref_attn = _reference(q, k, v, temperature)
    assert jnp.allclose(out, ref_out, atol=1e-5, rtol=1e-5)
    assert jnp.allclose(attn, ref_attn, atol=1e-5, rtol=1e-5)

    print("KERNEL_OK")
</pallas_src>

<mosaic_0001>
module attributes {stable_mosaic.version = 11 : i64} {
  func.func @_sdpa_kernel(%arg0: i32, %arg1: i32, %arg2: memref<2x8x32xf32, #tpu.memory_space<vmem>>, %arg3: memref<2x8x32xf32, #tpu.memory_space<vmem>>, %arg4: memref<2x8x32xf32, #tpu.memory_space<vmem>>, %arg5: memref<2x8x32xf32, #tpu.memory_space<vmem>>, %arg6: memref<2x8x8xf32, #tpu.memory_space<vmem>>) attributes {dimension_semantics = [#tpu.dimension_semantics<parallel>, #tpu.dimension_semantics<parallel>], iteration_bounds = array<i64: 1, 1>, scalar_prefetch = 0 : i64, scratch_operands = 0 : i64, tpu.core_type = #tpu.core_type<tc>, window_params = [{transform_indices = @transform_0, window_bounds = array<i64: 2, 8, 32>}, {transform_indices = @transform_1, window_bounds = array<i64: 2, 8, 32>}, {transform_indices = @transform_2, window_bounds = array<i64: 2, 8, 32>}, {transform_indices = @transform_3, window_bounds = array<i64: 2, 8, 32>}, {transform_indices = @transform_4, window_bounds = array<i64: 2, 8, 8>}]} {
    %c0 = arith.constant 0 : index
    %c0_0 = arith.constant 0 : index
    %c0_1 = arith.constant 0 : index
    %0 = vector.load %arg2[%c0, %c0_0, %c0_1] : memref<2x8x32xf32, #tpu.memory_space<vmem>>, vector<2x8x32xf32>
    %c0_2 = arith.constant 0 : index
    %c0_3 = arith.constant 0 : index
    %c0_4 = arith.constant 0 : index
    %1 = vector.load %arg3[%c0_2, %c0_3, %c0_4] : memref<2x8x32xf32, #tpu.memory_space<vmem>>, vector<2x8x32xf32>
    %c0_5 = arith.constant 0 : index
    %c0_6 = arith.constant 0 : index
    %c0_7 = arith.constant 0 : index
    %2 = vector.load %arg4[%c0_5, %c0_6, %c0_7] : memref<2x8x32xf32, #tpu.memory_space<vmem>>, vector<2x8x32xf32>
    %cst = arith.constant dense<0.000000e+00> : vector<2x8x8xf32>
    %3 = tpu.matmul %0, %1, %cst {dimension_numbers = #tpu.dot_dimension_numbers<[2], [2], [1], [1], [0, 0, 0, 1, 1, 1], [0], [0]>} : vector<2x8x32xf32>, vector<2x8x32xf32>, vector<2x8x8xf32> -> vector<2x8x8xf32>
    %cst_8 = arith.constant 0.176776692 : f32
    %4 = vector.broadcast %cst_8 : f32 to vector<2x8x8xf32>
    %5 = arith.mulf %3, %4 : vector<2x8x8xf32>
    %cst_9 = arith.constant dense<0xFF800000> : vector<2x8xf32>
    %6 = vector.multi_reduction <maximumf>, %5, %cst_9 [2] : vector<2x8x8xf32> to vector<2x8xf32>
    %7 = vector.shape_cast %6 : vector<2x8xf32> to vector<2x8x1xf32>
    %8 = vector.broadcast %7 : vector<2x8x1xf32> to vector<2x8x8xf32>
    %9 = arith.subf %5, %8 : vector<2x8x8xf32>
    %10 = math.exp %9 : vector<2x8x8xf32>
    %cst_10 = arith.constant dense<0.000000e+00> : vector<2x8xf32>
    %11 = vector.multi_reduction <add>, %10, %cst_10 [2] : vector<2x8x8xf32> to vector<2x8xf32>
    %12 = vector.shape_cast %11 : vector<2x8xf32> to vector<2x8x1xf32>
    %13 = tpu.reciprocal %12 : vector<2x8x1xf32> -> vector<2x8x1xf32>
    %14 = vector.broadcast %13 : vector<2x8x1xf32> to vector<2x8x8xf32>
    %15 = arith.mulf %10, %14 : vector<2x8x8xf32>
    %cst_11 = arith.constant dense<0.000000e+00> : vector<2x8x32xf32>
    %16 = tpu.matmul %15, %2, %cst_11 {dimension_numbers = #tpu.dot_dimension_numbers<[2], [1], [1], [2], [0, 0, 0, 1, 1, 2], [0], [0]>} : vector<2x8x8xf32>, vector<2x8x32xf32>, vector<2x8x32xf32> -> vector<2x8x32xf32>
    %c0_12 = arith.constant 0 : index
    %c0_13 = arith.constant 0 : index
    %c0_14 = arith.constant 0 : index
    %17 = vector.load %arg5[%c0_12, %c0_13, %c0_14] : memref<2x8x32xf32, #tpu.memory_space<vmem>>, vector<2x8x32xf32>
    tpu.vector_store %arg5[%c0_12, %c0_13, %c0_14], %16 {strides = array<i32>} : memref<2x8x32xf32, #tpu.memory_space<vmem>>, vector<2x8x32xf32>,
    %c0_15 = arith.constant 0 : index
    %c0_16 = arith.constant 0 : index
    %c0_17 = arith.constant 0 : index
    %18 = vector.load %arg6[%c0_15, %c0_16, %c0_17] : memref<2x8x8xf32, #tpu.memory_space<vmem>>, vector<2x8x8xf32>
    tpu.vector_store %arg6[%c0_15, %c0_16, %c0_17], %15 {strides = array<i32>} : memref<2x8x8xf32, #tpu.memory_space<vmem>>, vector<2x8x8xf32>,
    return
  }
  func.func @transform_0(%arg0: i32, %arg1: i32) -> (i32, i32, i32) {
    %c0_i32 = arith.constant 0 : i32
    %c0_i32_0 = arith.constant 0 : i32
    return %arg0, %arg1, %c0_i32 : i32, i32, i32
  }
  func.func @transform_1(%arg0: i32, %arg1: i32) -> (i32, i32, i32) {
    %c0_i32 = arith.constant 0 : i32
    %c0_i32_0 = arith.constant 0 : i32
    %c0_i32_1 = arith.constant 0 : i32
    return %arg0, %c0_i32, %c0_i32_0 : i32, i32, i32
  }
  func.func @transform_2(%arg0: i32, %arg1: i32) -> (i32, i32, i32) {
    %c0_i32 = arith.constant 0 : i32
    %c0_i32_0 = arith.constant 0 : i32
    %c0_i32_1 = arith.constant 0 : i32
    return %arg0, %c0_i32, %c0_i32_0 : i32, i32, i32
  }
  func.func @transform_3(%arg0: i32, %arg1: i32) -> (i32, i32, i32) {
    %c0_i32 = arith.constant 0 : i32
    %c0_i32_0 = arith.constant 0 : i32
    return %arg0, %arg1, %c0_i32 : i32, i32, i32
  }
  func.func @transform_4(%arg0: i32, %arg1: i32) -> (i32, i32, i32) {
    %c0_i32 = arith.constant 0 : i32
    %c0_i32_0 = arith.constant 0 : i32
    return %arg0, %arg1, %c0_i32 : i32, i32, i32
  }
}

</mosaic_0001>

<bundles_post_ra>
// kernel: tpu_custom_call.1
= control target key start
LH: loop header
LB: loop body
LE: loop exit
PB: predicated region body
PF: predicated region fallthrough
CT: control target
= control target key end

     0   :  { %10 = vsyncpa [#allocation3], 0  ;;  %s664_s0 = inlined_call_operand.hbm [shape: f32[2,8,32], index: 0, kind: input, shape index: {}]   ;;  %s665_s1 = inlined_call_operand.hbm [shape: f32[2,8,32], index: 1, kind: input, shape index: {}]   ;;  %s666_s2 = inlined_call_operand.hbm [shape: f32[2,8,32], index: 2, kind: input, shape index: {}]   ;;  %s667_s3 = inlined_call_operand.hbm [shape: f32[2,8,32], index: 3, kind: output, shape index: {0}]   ;;  %s668_s4 = inlined_call_operand.hbm [shape: f32[2,8,8], index: 4, kind: output, shape index: {1}]  }
   0x1   :  { %11 = vsyncpa [#allocation6], 0 }
   0x2   :  { %12 = vsyncpa [#allocation4], 0 }
   0x3   :  { %13 = vsyncpa [#allocation10], 0  ;;  %s586_s15 = smov [#allocation5]   ;;  %s587_s17 = smov [#allocation2]  }
   0x4   :  { %s31_s16 = sshll.u32 %s586_s15, 4  ;;  %s19_s18 = sshll.u32 %s587_s17, 4  ;;  %s32_s16 = int_to_ptr.vmem [resolvable:$true] %s31_s16  ;;  %s20_s18 = int_to_ptr.vmem [resolvable:$true] %s19_s18 }
   0x5   :  { %s486_s19 = scalar_lea.vmem %s32_s16, 256  ;;  %p491_p1 = scmp.lt.s32.totalorder %s32_s16, %s32_s16 }
   0x6   :  { %p487_p0 = scmp.ne.s32.totalorder %s32_s16, %s486_s19  ;;  %p492_p2 = scmp.lt.s32.totalorder %s486_s19, %s486_s19 }
   0x8   :  { %p493_p3 = por %p492_p2, %p491_p1 }
   0xa   :  { %p494_p4 = pnand %p493_p3, %p487_p0 }
   0xc   :  { %497 = shalt.err (!%p494_p4)
}
   0xd   :  { %s588_s20 = smov 128   ;;  %s589_s21 = smov 8  }
   0xe   :  { %37 = dma.hbm_to_vmem [thread:$0]  %s665_s1, 256, %s32_s16, [#allocation6], %s588_s20, %s588_s20, %s589_s21  }
   0xf   :  { %s506_s24 = scalar_lea.vmem %s20_s18, 256  ;;  %p511_p6 = scmp.lt.s32.totalorder %s20_s18, %s20_s18 }
  0x10   :  { %p507_p5 = scmp.ne.s32.totalorder %s20_s18, %s506_s24  ;;  %p512_p7 = scmp.lt.s32.totalorder %s506_s24, %s506_s24 }
  0x12   :  { %p513_p8 = por %p512_p7, %p511_p6 }
  0x14   :  { %p514_p9 = pnand %p513_p8, %p507_p5 }
  0x16   :  { %517 = shalt.err (!%p514_p9)
}
  0x17   :  { %25 = dma.hbm_to_vmem [thread:$0]  %s664_s0, 256, %s20_s18, [#allocation3], %s588_s20, %s588_s20, %s589_s21  }
  0x18   :  { %s590_s27 = smov [#allocation7]  }
  0x19   :  { %s43_s28 = sshll.u32 %s590_s27, 4  ;;  %s44_s28 = int_to_ptr.vmem [resolvable:$true] %s43_s28 }
  0x1a   :  { %s526_s29 = scalar_lea.vmem %s44_s28, 256  ;;  %p531_p11 = scmp.lt.s32.totalorder %s44_s28, %s44_s28 }
  0x1b   :  { %p527_p10 = scmp.ne.s32.totalorder %s44_s28, %s526_s29  ;;  %p532_p12 = scmp.lt.s32.totalorder %s526_s29, %s526_s29 }
  0x1d   :  { %p533_p13 = por %p532_p12, %p531_p11 }
  0x1f   :  { %p534_p0 = pnand %p533_p13, %p527_p10 }
  0x21   :  { %537 = shalt.err (!%p534_p0)
}
  0x22   :  { %49 = dma.hbm_to_vmem [thread:$0]  %s666_s2, 256, %s44_s28, [#allocation6], %s588_s20, %s588_s20, %s589_s21  }
  0x23   :  { %578 = dma.done.wait [#allocation3], 256  }
  0x24   :  { %579 = vsyncadd [#allocation3], 4294967040 }
  0x25   :  { %580 = dma.done.wait [#allocation6], 512  }
  0x26   :  { %581 = vsyncadd [#allocation6], 4294966784  ;;  %v591_v0 = vmov 0.0   ;;  %vm592_vm0 = vmmov 0   ;;  %vm65_vm1 = vcmask 261120   ;;  %v61_v1 = vld [vmem:[#allocation5] sm:$0xff] }
  0x27   :  { %441 = vmatprep.subr.mxu0 %v591_v0  ;;  %446 = vmatprep.subr.mxu1 %v591_v0  ;;  %v62_v2 = vld [vmem:[#allocation5 + $0x8] sm:$0xff]  ;;  %v59_v3 = vld [vmem:[#allocation2] sm:$0xff]  ;;  %v60_v4 = vld [vmem:[#allocation2 + $0x8] sm:$0xff]  ;;  %vm220_vm2 = vcmask 64512   ;;  %s593_s0 = smov [#allocation9]  }
  0x28   :  { %443 = vmatprep.mubr.msk.f32.mxu0 %vm592_vm0, %v591_v0  ;;  %448 = vmatprep.mubr.msk.f32.mxu1 %vm592_vm0, %v591_v0  ;;  %v63_v23 = vld [vmem:[#allocation7] sm:$0xff]  ;;  %v64_v24 = vld [vmem:[#allocation7 + $0x8] sm:$0xff]  ;;  %s410_s2 = sshll.u32 %s593_s0, 4  ;;  %s411_s2 = int_to_ptr.vmem [resolvable:$true] %s410_s2 }
  0x29   :  { %442 = vmatpush3.xpose.msk.msra.mxu0 %vm65_vm1, %v61_v1  ;;  %447 = vmatpush3.xpose.msk.msra.mxu1 %vm65_vm1, %v62_v2  ;;  %s538_s5 = scalar_lea.vmem %s411_s2, 256  ;;  %p543_p2 = scmp.lt.s32.totalorder %s411_s2, %s411_s2 }
  0x2a   :  { %451 = vmatprep.subr.mxu0 %v591_v0  ;;  %456 = vmatprep.subr.mxu1 %v591_v0  ;;  %p539_p1 = scmp.ne.s32.totalorder %s411_s2, %s538_s5  ;;  %p544_p3 = scmp.lt.s32.totalorder %s538_s5, %s538_s5 }
  0x2c   :  { %444 = vmatmul.mubr.msk.f32.vlgmr.msra.gmra.mxu0 %vm65_vm1, %v59_v3  ;;  %449 = vmatmul.mubr.msk.f32.vlgmr.msra.gmra.mxu1 %vm65_vm1, %v60_v4  ;;  %p545_p4 = por %p544_p3, %p543_p2 }
  0x2d   :  { %453 = vmatprep.mubr.msk.f32.mxu0 %vm592_vm0, %v591_v0  ;;  %458 = vmatprep.mubr.msk.f32.mxu1 %vm592_vm0, %v591_v0 }
  0x2e   :  { %452 = vmatpush3.msra.mxu0 %v63_v23  ;;  %457 = vmatpush3.msra.mxu1 %v64_v24  ;;  %p546_p5 = pnand %p545_p4, %p539_p1 }
  0xec   :  { %v138_v5 = vpop.f32.mrf.mxu0  ;;  %v214_v6 = vpop.f32.mrf.mxu1 }
  0xed   :  { %v218_v7 = vmul.f32 0.17677669, %v138_v5  ;;  %v219_v8 = vmul.f32 0.17677669, %v214_v6 }
  0xee   :  { %v445_v9 = vpop.f32.mrf.mxu0  ;;  %v450_v10 = vpop.f32.mrf.mxu1 }
  0xef   :  { %v221_v11 = vsel %vm220_vm2, %v218_v7, -inf  ;;  %v224_v12 = vsel %vm220_vm2, %v219_v8, -inf }
  0xf0   :  { %222 = vmax.xlane.f32.xlu0 %v221_v11 }
  0xf4   :  { %225 = vmax.xlane.f32.xlu0 %v224_v12 }
 0x179   :  { %v223_v13 = vpop.xlane.xlu0 %222 }
 0x17a   :  { %v227_v14 = vsub.f32 %v218_v7, %v223_v13 }
 0x17c   :  { %v229_v15 = vmul.f32 1.442695, %v227_v14 }
 0x17d   :  { %v226_v16 = vpop.xlane.xlu0 %225 }
 0x17e   :  { %470 = vpow2.f32 %v229_v15  ;;  %v228_v17 = vsub.f32 %v219_v8, %v226_v16 }
 0x180   :  { %v231_v18 = vmul.f32 1.442695, %v228_v17 }
 0x182   :  { %472 = vpow2.f32 %v231_v18 }
 0x18b   :  { %v471_v19 = vpop.eup %470 }
 0x18c   :  { %v233_v20 = vsel %vm220_vm2, %v471_v19, 0.0 }
 0x18d   :  { %234 = vadd.xlane.f32.xlu1 %v233_v20 }
 0x18f   :  { %v473_v21 = vpop.eup %472 }
 0x190   :  { %v236_v22 = vsel %vm220_vm2, %v473_v21, 0.0 }
 0x191   :  { %237 = vadd.xlane.f32.xlu1 %v236_v22 }
 0x216   :  { %v235_v25 = vpop.xlane.xlu1 %234 }
 0x217   :  { %474 = vrcp.f32 %v235_v25 }
 0x21a   :  { %v238_v26 = vpop.xlane.xlu1 %237 }
 0x21b   :  { %476 = vrcp.f32 %v238_v26 }
 0x224   :  { %v475_v27 = vpop.eup %474 }
 0x225   :  { %v241_v28 = vmul.f32 %v475_v27, %v471_v19 }
 0x227   :  { %454 = vmatmul.mubr.msk.f32.vlgmr.msra.gmra.mxu0 %vm220_vm2, %v241_v28  ;;  %391 = vst.msk [vmem:[#allocation9] sm:$0xff] %vm220_vm2, %v241_v28 }
 0x228   :  { %v477_v29 = vpop.eup %476 }
 0x229   :  { %v242_v30 = vmul.f32 %v477_v29, %v473_v21 }
 0x22b   :  { %459 = vmatmul.mubr.msk.f32.vlgmr.msra.gmra.mxu1 %vm220_vm2, %v242_v30  ;;  %392 = vst.msk [vmem:[#allocation9 + $0x8] sm:$0xff] %vm220_vm2, %v242_v30 }
 0x22c   :  { %549 = shalt.err (!%p546_p5)
}
 0x22d   :  { %416 = dma.vmem_to_hbm [thread:$0]  %s411_s2, 256, %s668_s4, [#allocation10], %s588_s20, %s588_s20, %s589_s21  }
 0x22e   :  { %s594_s8 = smov [#allocation8]  }
 0x22f   :  { %s398_s9 = sshll.u32 %s594_s8, 4  ;;  %s399_s9 = int_to_ptr.vmem [resolvable:$true] %s398_s9 }
 0x230   :  { %s558_s10 = scalar_lea.vmem %s399_s9, 256  ;;  %p563_p7 = scmp.lt.s32.totalorder %s399_s9, %s399_s9 }
 0x231   :  { %p559_p6 = scmp.ne.s32.totalorder %s399_s9, %s558_s10  ;;  %p564_p8 = scmp.lt.s32.totalorder %s558_s10, %s558_s10 }
 0x233   :  { %p565_p9 = por %p564_p8, %p563_p7 }
 0x235   :  { %p566_p10 = pnand %p565_p9, %p559_p6 }
 0x2e7   :  { %v312_v31 = vpop.f32.mrf.mxu0 }
 0x2e8   :  { %389 = vst.msk [vmem:[#allocation8] sm:$0xff] %vm65_vm1, %v312_v31 }
 0x2e9   :  { %v455_v32 = vpop.f32.mrf.mxu0 }
 0x2eb   :  { %v385_v33 = vpop.f32.mrf.mxu1 }
 0x2ec   :  { %390 = vst.msk [vmem:[#allocation8 + $0x8] sm:$0xff] %vm65_vm1, %v385_v33 }
 0x2ed   :  { %v460_v34 = vpop.f32.mrf.mxu1 }
 0x2ee   :  { %569 = shalt.err (!%p566_p10)
}
 0x2ef   :  { %404 = dma.vmem_to_hbm [thread:$0]  %s399_s9, 256, %s667_s3, [#allocation4], %s588_s20, %s588_s20, %s589_s21  }
 0x2f0   :  { %582 = dma.done.wait [#allocation4], 256  }
 0x2f1   :  { %583 = vsyncadd [#allocation4], 4294967040 }
 0x2f2   :  { %584 = dma.done.wait [#allocation10], 256  }
 0x2f3   :  { %585 = vsyncadd [#allocation10], 4294967040 }
 0x2f4   :  { %423 = vsyncpa [#allocation3], 1 }
 0x2f5   :  { %424 = vsyncpa [#allocation6], 1 }
 0x2f6   :  { %425 = vsyncpa [#allocation4], 1 }
 0x2f7   :  { %426 = vsyncpa [#allocation10], 1 }

</bundles_post_ra>
